<compile_context>
chip_gen: v5e
topology: v5e:2x2
jax: 0.10.0
libtpu: 0.0.40
codegen_flags: <defaults>
</compile_context>

<pallas_src>
import functools
import math

import jax
import jax.numpy as jnp
from jax import lax
from jax.experimental import pallas as pl
from jax.experimental.pallas import tpu as pltpu


def _round_up(x, mult):
    return ((x + mult - 1) // mult) * mult


def _choose_tile_and_pad(n, max_tile):
    """Pick a lane tile (>=128, multiple of 128) and n_pad with tile | n_pad.

    Avoids the "tile must divide round_up(n,128)" collapse to 128-wide tiles:
    instead pad n up to a multiple of the largest tile whose padding overhead
    stays <= 12.5%.
    """
    assert max_tile % 128 == 0 and max_tile >= 128
    n128 = _round_up(n, 128)
    if n128 <= max_tile:
        return n128, n128
    for t in (max_tile, 1024, 512, 256, 128):
        if t > max_tile:
            continue
        n_pad = _round_up(n, t)
        if n_pad * 8 <= n128 * 9:          # <= 12.5% padding overhead
            return t, n_pad
    return 128, n128


def _spectral_kernel(t0_ref, qs_ref, qf_ref, lf_ref, ls_ref, b_ref, *, gamma):
    """B[:, j] = Q_F @ (G[:, j] * (T0 @ Q_S)[:, j]),  T0 = Q_F^T X^T.

    Accumulates directly into the f32 output block (resident across the k
    reduction axis), no scratch buffer needed.
    """
    k = pl.program_id(1)

    @pl.when(k == 0)
    def _():
        b_ref[...] = jnp.zeros_like(b_ref)

    # acc += T0[:, k_tile] @ Q_S[k_tile, j_tile]   (natural MXU orientation)
    b_ref[...] += jnp.dot(t0_ref[...], qs_ref[...],
                          preferred_element_type=jnp.float32)

    @pl.when(k == pl.num_programs(1) - 1)
    def _():
        # Spectral filter as a VPU broadcast; exact f32 divide since G can be
        # large when gamma*lf*ls -> 1.
        g = 1.0 / (1.0 - gamma * lf_ref[...] * ls_ref[...])     # (m_pad, tn)
        b_ref[...] = jnp.dot(qf_ref[...], g * b_ref[...],
                             preferred_element_type=jnp.float32)


def _project_kernel(qs_ref, mt_ref, wbt_ref, out_ref, acc_ref, *, mt_resident):
    """out[j, :] = normalize_rows(sum_k Q_S[j, k] @ B^T[k, :]) @ W_B^T."""
    k = pl.program_id(1)

    @pl.when(k == 0)
    def _():
        acc_ref[...] = jnp.zeros_like(acc_ref)

    # B^T panel: either VMEM-resident (index the k-th slab of the 3-D panel)
    # or streamed one slab per grid step.
    mt = mt_ref[k] if mt_resident else mt_ref[0]               # (tk, m_pad)

    acc_ref[...] += jnp.dot(qs_ref[...], mt,
                            preferred_element_type=jnp.float32)

    @pl.when(k == pl.num_programs(1) - 1)
    def _():
        z = acc_ref[...]                                       # (tn, m_pad) f32
        sumsq = jnp.sum(z * z, axis=-1, keepdims=True)         # (tn, 1)
        # 1/max(||z||, 1e-12) == rsqrt(max(sumsq, 1e-24)) : EUP rsqrt + vmul.
        inv = lax.rsqrt(jnp.maximum(sumsq, 1e-24))
        # TODO(synk): dropout is identity in eval mode; training-mode dropout
        # would use pltpu.prng_seed / pltpu.stateful_bernoulli here.
        out_ref[...] = jnp.dot(z * inv, wbt_ref[...],
                               preferred_element_type=jnp.float32
                               ).astype(out_ref.dtype)


def model_forward(X, F_w, W_B, S, gamma, *, tile=1024, use_bf16=True,
                  panel_resident_bytes=4 * 1024 * 1024,
                  vmem_limit_bytes=48 * 1024 * 1024):
    """X: (n, m) node features. Returns (n, m_y)."""
    n, m = X.shape
    m_y = W_B.shape[0]
    f32 = jnp.float32
    stream_dt = jnp.bfloat16 if use_bf16 else jnp.float32
    sbytes = jnp.dtype(stream_dt).itemsize

    # ---- glue: eigendecompositions (no Pallas equivalent, plain JAX) ----
    # TODO(synk): full eigh is used instead of the truncated num_eigenvec
    # decomposition of the original IDM_SGC — same closed-form semantics.
    eps_f = 1e-12
    ff = F_w.T @ F_w
    g_f = ff / (jnp.linalg.norm(ff) + eps_f)
    lam_f, q_f = jnp.linalg.eigh(g_f)          # (m,), (m, m)
    lam_s, q_s = jnp.linalg.eigh(S)            # (n,), (n, n)

    # ---- padding to lane/sublane-friendly shapes ----
    m_pad = _round_up(m, 16)                   # 16: bf16 sublane packing safe
    m_y_pad = _round_up(m_y, 8)
    t, n_pad = _choose_tile_and_pad(n, tile)
    kt = n_pad // t
    grid = (kt, kt)                            # (j output tile, k reduction)

    # Hoist the Q_F^T fold to the wrapper: T0 = Q_F^T X^T, shape (m, n).
    t0 = jnp.pad((q_f.T @ X.T).astype(f32),
                 ((0, m_pad - m), (0, n_pad - n))).astype(stream_dt)
    qs = jnp.pad(q_s.astype(f32),
                 ((0, n_pad - n), (0, n_pad - n))).astype(stream_dt)
    qf = jnp.pad(q_f.astype(f32), ((0, m_pad - m), (0, m_pad - m)))
    lf = jnp.pad(lam_f.astype(f32), (0, m_pad - m)).reshape(m_pad, 1)
    ls = jnp.pad(lam_s.astype(f32), (0, n_pad - n)).reshape(1, n_pad)
    wbt = jnp.pad(W_B.T.astype(f32), ((0, m_pad - m), (0, m_y_pad - m_y)))

    cparams = pltpu.CompilerParams(
        dimension_semantics=("parallel", "arbitrary"),
        vmem_limit_bytes=int(vmem_limit_bytes))

    # ---- kernel 1: B = Q_F @ (G * (T0 @ Q_S)),  (m_pad, n_pad) f32 ----
    cost1 = pl.CostEstimate(
        flops=2 * m_pad * n_pad * n_pad + 2 * m_pad * m_pad * n_pad
              + 3 * m_pad * n_pad,
        transcendentals=0,
        bytes_accessed=(sbytes * n_pad * n_pad                 # Q_S stream
                        + sbytes * m_pad * n_pad * kt          # T0 re-reads
                        + 4 * m_pad * n_pad                    # B writeback
                        + 4 * (m_pad * m_pad + m_pad + n_pad)))
    b_mat = pl.pallas_call(
        functools.partial(_spectral_kernel, gamma=float(gamma)),
        out_shape=jax.ShapeDtypeStruct((m_pad, n_pad), f32),
        grid_spec=pltpu.PrefetchScalarGridSpec(
            num_scalar_prefetch=0,
            grid=grid,
            in_specs=[
                pl.BlockSpec((m_pad, t), lambda j, k: (0, k)),       # T0 panel
                pl.BlockSpec((t, t), lambda j, k: (k, j)),           # Q_S block
                pl.BlockSpec((m_pad, m_pad), lambda j, k: (0, 0)),   # Q_F (resident)
                pl.BlockSpec((m_pad, 1), lambda j, k: (0, 0)),       # lambda_F
                pl.BlockSpec((1, t), lambda j, k: (0, j)),           # lambda_S panel
            ],
            out_specs=pl.BlockSpec((m_pad, t), lambda j, k: (0, j))),
        compiler_params=cparams,
        cost_estimate=cost1,
    )(t0, qs, qf, lf, ls)

    # Cheap (m, n) wrapper transpose so kernel 2 streams Q_S untransposed.
    mt3 = b_mat.T.astype(stream_dt).reshape(kt, t, m_pad)      # (kt, t, m_pad)
    mt_bytes = n_pad * m_pad * sbytes
    mt_resident = mt_bytes <= panel_resident_bytes
    if mt_resident:
        mt_spec = pl.BlockSpec((kt, t, m_pad), lambda j, k: (0, 0, 0))
        mt_reads = 1
    else:
        mt_spec = pl.BlockSpec((1, t, m_pad), lambda j, k: (k, 0, 0))
        mt_reads = kt

    # ---- kernel 2: out = normalize_rows(Q_S @ B^T) @ W_B^T,  (n_pad, m_y_pad) ----
    cost2 = pl.CostEstimate(
        flops=2 * n_pad * n_pad * m_pad + 2 * n_pad * m_pad * m_y_pad
              + 4 * n_pad * m_pad,
        transcendentals=n_pad,
        bytes_accessed=(sbytes * n_pad * n_pad                 # Q_S stream
                        + sbytes * m_pad * n_pad * mt_reads    # B^T panel
                        + 4 * (n_pad * m_y_pad + m_pad * m_y_pad)))
    out = pl.pallas_call(
        functools.partial(_project_kernel, mt_resident=mt_resident),
        out_shape=jax.ShapeDtypeStruct((n_pad, m_y_pad), f32),
        grid_spec=pltpu.PrefetchScalarGridSpec(
            num_scalar_prefetch=0,
            grid=grid,
            in_specs=[
                pl.BlockSpec((t, t), lambda j, k: (j, k)),            # Q_S block
                mt_spec,                                              # B^T panel
                pl.BlockSpec((m_pad, m_y_pad), lambda j, k: (0, 0)),  # W_B^T
            ],
            out_specs=pl.BlockSpec((t, m_y_pad), lambda j, k: (j, 0)),
            scratch_shapes=[pltpu.VMEM((t, m_pad), f32)]),
        compiler_params=cparams,
        cost_estimate=cost2,
    )(qs, mt3, wbt)

    return out[:n, :m_y]


def _reference_forward(X, F_w, W_B, S, gamma):
    """Pure-JAX reference mirroring the PyTorch forward (eval mode)."""
    ff = F_w.T @ F_w
    g_f = ff / (jnp.linalg.norm(ff) + 1e-12)
    lam_f, q_f = jnp.linalg.eigh(g_f)
    lam_s, q_s = jnp.linalg.eigh(S)
    G = 1.0 / (1.0 - gamma * lam_f[:, None] * lam_s[None, :])
    Z = q_f @ (G * (q_f.T @ X.T @ q_s)) @ q_s.T
    out = Z.T
    norm = jnp.sqrt(jnp.sum(out * out, axis=-1, keepdims=True))
    out = out / jnp.maximum(norm, 1e-12)
    return out @ W_B.T


if __name__ == "__main__":
    # Small synthetic chain-graph setup (n chosen so the padded grid is > 1x1).
    n, m, m_y = 200, 32, 4
    gamma = 0.8

    key = jax.random.PRNGKey(0)
    k_f, k_b, k_x = jax.random.split(key, 3)

    # F: xavier_uniform_((m, m))
    a = math.sqrt(6.0 / (m + m))
    F_w = jax.random.uniform(k_f, (m, m), minval=-a, maxval=a,
                             dtype=jnp.float32)
    # B: Linear(m, m_y, bias=False) default reset (uniform(-1/sqrt(m), 1/sqrt(m)))
    bound = 1.0 / math.sqrt(m)
    W_B = jax.random.uniform(k_b, (m_y, m), minval=-bound, maxval=bound,
                             dtype=jnp.float32)
    # Node features X: (n, m)
    X = jax.random.normal(k_x, (n, m), dtype=jnp.float32)

    # Symmetrically normalized chain adjacency (with self loops), |eig| <= 1.
    A = jnp.zeros((n, n), dtype=jnp.float32)
    idx = jnp.arange(n - 1)
    A = A.at[idx, idx + 1].set(1.0)
    A = A.at[idx + 1, idx].set(1.0)
    A = A + jnp.eye(n, dtype=jnp.float32)
    d = A.sum(axis=1)
    S = A / jnp.sqrt(d[:, None] * d[None, :])

    ref = jax.block_until_ready(_reference_forward(X, F_w, W_B, S, gamma))

    # 1) f32 path, streamed B^T panel, tile=128 -> padded n=256, 2x2 grid:
    #    exercises accumulation / pipelining, validates tightly.
    out32 = model_forward(X, F_w, W_B, S, gamma, tile=128, use_bf16=False,
                          panel_resident_bytes=0)
    out32 = jax.block_until_ready(out32)
    assert out32.shape == (n, m_y), out32.shape
    err32 = float(jnp.max(jnp.abs(out32 - ref)))
    assert err32 < 5e-4, err32

    # 2) default perf path: bf16 streamed operands, VMEM-resident B^T panel.
    #    bf16 operand rounding gives ~1e-3 abs error at these magnitudes.
    outbf = model_forward(X, F_w, W_B, S, gamma, tile=128, use_bf16=True)
    outbf = jax.block_until_ready(outbf)
    assert outbf.shape == (n, m_y), outbf.shape
    errbf = float(jnp.max(jnp.abs(outbf - ref)))
    assert errbf < 3e-2, errbf

    print("KERNEL_OK")
</pallas_src>

<mosaic_0001>
module attributes {stable_mosaic.version = 11 : i64} {
  func.func @_spectral_kernel(%arg0: i32, %arg1: i32, %arg2: memref<32x128xf32, #tpu.memory_space<vmem>>, %arg3: memref<128x128xf32, #tpu.memory_space<vmem>>, %arg4: memref<32x32xf32, #tpu.memory_space<vmem>>, %arg5: memref<32x1xf32, #tpu.memory_space<vmem>>, %arg6: memref<1x128xf32, #tpu.memory_space<vmem>>, %arg7: memref<32x128xf32, #tpu.memory_space<vmem>>) attributes {dimension_semantics = [#tpu.dimension_semantics<parallel>, #tpu.dimension_semantics<arbitrary>], iteration_bounds = array<i64: 2, 2>, scalar_prefetch = 0 : i64, scratch_operands = 0 : i64, tpu.core_type = #tpu.core_type<tc>, window_params = [{transform_indices = @transform_0, window_bounds = array<i64: 32, 128>}, {transform_indices = @transform_1, window_bounds = array<i64: 128, 128>}, {pipeline_mode = #tpu.pipeline_mode<synchronous>, transform_indices = @transform_2, window_bounds = array<i64: 32, 32>}, {pipeline_mode = #tpu.pipeline_mode<synchronous>, transform_indices = @transform_3, window_bounds = array<i64: 32, 1>}, {transform_indices = @transform_4, window_bounds = array<i64: 1, 128>}, {transform_indices = @transform_5, window_bounds = array<i64: 32, 128>}]} {
    %c0_i32 = arith.constant 0 : i32
    %0 = arith.cmpi eq, %arg1, %c0_i32 : i32
    %1 = arith.extui %0 : i1 to i32
    %c0_i32_0 = arith.constant 0 : i32
    %2 = arith.cmpi ne, %1, %c0_i32_0 : i32
    scf.if %2 {
      %cst_9 = arith.constant 0.000000e+00 : f32
      %12 = vector.broadcast %cst_9 : f32 to vector<32x128xf32>
      %c0_10 = arith.constant 0 : index
      %c0_11 = arith.constant 0 : index
      %13 = vector.load %arg7[%c0_10, %c0_11] : memref<32x128xf32, #tpu.memory_space<vmem>>, vector<32x128xf32>
      tpu.vector_store %arg7[%c0_10, %c0_11], %12 {strides = array<i32>} : memref<32x128xf32, #tpu.memory_space<vmem>>, vector<32x128xf32>,
    } else {
    }
    %c0 = arith.constant 0 : index
    %c0_1 = arith.constant 0 : index
    %3 = vector.load %arg7[%c0, %c0_1] : memref<32x128xf32, #tpu.memory_space<vmem>>, vector<32x128xf32>
    %c0_2 = arith.constant 0 : index
    %c0_3 = arith.constant 0 : index
    %4 = vector.load %arg2[%c0_2, %c0_3] : memref<32x128xf32, #tpu.memory_space<vmem>>, vector<32x128xf32>
    %c0_4 = arith.constant 0 : index
    %c0_5 = arith.constant 0 : index
    %5 = vector.load %arg3[%c0_4, %c0_5] : memref<128x128xf32, #tpu.memory_space<vmem>>, vector<128x128xf32>
    %cst = arith.constant dense<0.000000e+00> : vector<32x128xf32>
    %6 = tpu.matmul %4, %5, %cst {dimension_numbers = #tpu.dot_dimension_numbers<[1], [0], [0], [1], [0, 0, 1, 1], [], []>} : vector<32x128xf32>, vector<128x128xf32>, vector<32x128xf32> -> vector<32x128xf32>
    %7 = arith.addf %3, %6 : vector<32x128xf32>
    %c0_6 = arith.constant 0 : index
    %c0_7 = arith.constant 0 : index
    %8 = vector.load %arg7[%c0_6, %c0_7] : memref<32x128xf32, #tpu.memory_space<vmem>>, vector<32x128xf32>
    tpu.vector_store %arg7[%c0_6, %c0_7], %7 {strides = array<i32>} : memref<32x128xf32, #tpu.memory_space<vmem>>, vector<32x128xf32>,
    %c1_i32 = arith.constant 1 : i32
    %9 = arith.cmpi eq, %arg1, %c1_i32 : i32
    %10 = arith.extui %9 : i1 to i32
    %c0_i32_8 = arith.constant 0 : i32
    %11 = arith.cmpi ne, %10, %c0_i32_8 : i32
    scf.if %11 {
      %c0_9 = arith.constant 0 : index
      %c0_10 = arith.constant 0 : index
      %12 = vector.load %arg5[%c0_9, %c0_10] : memref<32x1xf32, #tpu.memory_space<vmem>>, vector<32x1xf32>
      %cst_11 = arith.constant 8.000000e-01 : f32
      %13 = vector.broadcast %cst_11 : f32 to vector<32x1xf32>
      %14 = arith.mulf %13, %12 : vector<32x1xf32>
      %c0_12 = arith.constant 0 : index
      %c0_13 = arith.constant 0 : index
      %15 = vector.load %arg6[%c0_12, %c0_13] : memref<1x128xf32, #tpu.memory_space<vmem>>, vector<1x128xf32>
      %16 = vector.broadcast %14 : vector<32x1xf32> to vector<32x128xf32>
      %17 = vector.broadcast %15 : vector<1x128xf32> to vector<32x128xf32>
      %18 = arith.mulf %16, %17 : vector<32x128xf32>
      %cst_14 = arith.constant 1.000000e+00 : f32
      %19 = vector.broadcast %cst_14 : f32 to vector<32x128xf32>
      %20 = arith.subf %19, %18 : vector<32x128xf32>
      %cst_15 = arith.constant 1.000000e+00 : f32
      %21 = vector.broadcast %cst_15 : f32 to vector<32x128xf32>
      %22 = arith.divf %21, %20 : vector<32x128xf32>
      %c0_16 = arith.constant 0 : index
      %c0_17 = arith.constant 0 : index
      %23 = vector.load %arg4[%c0_16, %c0_17] : memref<32x32xf32, #tpu.memory_space<vmem>>, vector<32x32xf32>
      %c0_18 = arith.constant 0 : index
      %c0_19 = arith.constant 0 : index
      %24 = vector.load %arg7[%c0_18, %c0_19] : memref<32x128xf32, #tpu.memory_space<vmem>>, vector<32x128xf32>
      %25 = arith.mulf %22, %24 : vector<32x128xf32>
      %cst_20 = arith.constant dense<0.000000e+00> : vector<32x128xf32>
      %26 = tpu.matmul %23, %25, %cst_20 {dimension_numbers = #tpu.dot_dimension_numbers<[1], [0], [0], [1], [0, 0, 1, 1], [], []>} : vector<32x32xf32>, vector<32x128xf32>, vector<32x128xf32> -> vector<32x128xf32>
      %c0_21 = arith.constant 0 : index
      %c0_22 = arith.constant 0 : index
      %27 = vector.load %arg7[%c0_21, %c0_22] : memref<32x128xf32, #tpu.memory_space<vmem>>, vector<32x128xf32>
      tpu.vector_store %arg7[%c0_21, %c0_22], %26 {strides = array<i32>} : memref<32x128xf32, #tpu.memory_space<vmem>>, vector<32x128xf32>,
    } else {
    }
    return
  }
  func.func @transform_0(%arg0: i32, %arg1: i32) -> (i32, i32) {
    %c0_i32 = arith.constant 0 : i32
    %c0_i32_0 = arith.constant 0 : i32
    return %c0_i32, %arg1 : i32, i32
  }
  func.func @transform_1(%arg0: i32, %arg1: i32) -> (i32, i32) {
    %c0_i32 = arith.constant 0 : i32
    return %arg1, %arg0 : i32, i32
  }
  func.func @transform_2(%arg0: i32, %arg1: i32) -> (i32, i32) {
    %c0_i32 = arith.constant 0 : i32
    %c0_i32_0 = arith.constant 0 : i32
    %c0_i32_1 = arith.constant 0 : i32
    return %c0_i32, %c0_i32_0 : i32, i32
  }
  func.func @transform_3(%arg0: i32, %arg1: i32) -> (i32, i32) {
    %c0_i32 = arith.constant 0 : i32
    %c0_i32_0 = arith.constant 0 : i32
    %c0_i32_1 = arith.constant 0 : i32
    return %c0_i32, %c0_i32_0 : i32, i32
  }
  func.func @transform_4(%arg0: i32, %arg1: i32) -> (i32, i32) {
    %c0_i32 = arith.constant 0 : i32
    %c0_i32_0 = arith.constant 0 : i32
    return %c0_i32, %arg0 : i32, i32
  }
  func.func @transform_5(%arg0: i32, %arg1: i32) -> (i32, i32) {
    %c0_i32 = arith.constant 0 : i32
    %c0_i32_0 = arith.constant 0 : i32
    return %c0_i32, %arg0 : i32, i32
  }
}

</mosaic_0001>

<bundles_post_ra>
// kernel: tpu_custom_call.1
= control target key start
LH: loop header
LB: loop body
LE: loop exit
PB: predicated region body
PF: predicated region fallthrough
CT: control target
= control target key end

     0   :  { %s1547_s0 = inlined_call_operand.hbm [shape: f32[32,256], index: 0, kind: input, shape index: {}]   ;;  %s1548_s1 = inlined_call_operand.hbm [shape: f32[256,256], index: 1, kind: input, shape index: {}]   ;;  %s1549_s2 = inlined_call_operand.vmem [shape: f32[32,32], index: 2, kind: input, shape index: {}]   ;;  %s1550_s3 = inlined_call_operand.vmem [shape: f32[32,1], index: 3, kind: input, shape index: {}]   ;;  %s1551_s4 = inlined_call_operand.vmem [shape: f32[1,256], index: 4, kind: input, shape index: {}]   ;;  %s1552_s5 = inlined_call_operand.hbm [shape: f32[32,256], index: 5, kind: output, shape index: {}]  }
   0x1   :  { %1564 = sst [smem:[#allocation19_spill]] %s1547_s0 }
   0x2   :  { %1565 = sst [smem:[#allocation20_spill]] %s1549_s2 }
   0x3   :  { %1566 = sst [smem:[#allocation21_spill]] %s1550_s3 }
   0x4   :  { %1567 = sst [smem:[#allocation22_spill]] %s1551_s4 }
   0x5   :  { %1568 = sst [smem:[#allocation23_spill]] %s1552_s5 }
   0x6   :  { %10 = vsyncpa [#allocation3], 0 }
   0x7   :  { %12 = vsyncpa [#allocation3 + $0x1], 0 }
   0x8   :  { %13 = vsyncpa [#allocation6], 0 }
   0x9   :  { %15 = vsyncpa [#allocation6 + $0x1], 0 }
   0xa   :  { %16 = vsyncpa [#allocation4], 0 }
   0xb   :  { %18 = vsyncpa [#allocation4 + $0x1], 0  ;;  %s1166_s18 = smov 0   ;;  %s1168_s19 = smov 0  }
   0xc   :  { %s1170_s20 = smov 0   ;;  %s1172_s21 = smov 0  }
   0xd   :  { %s1174_s22 = smov 0   ;;  %s1176_s23 = smov 0  }
   0xe   :  { %s1178_s24 = smov 0   ;;  %s1180_s25 = smov 0  }
   0xf   :  { %s1182_s26 = smov 0   ;;  %s1184_s27 = smov 0  }
  0x10   :  { %s1186_s28 = smov 0   ;;  %s1188_s29 = smov 0  }
  0x11   :  { %s1190_s30 = smov 0   ;;  %s1192_s6 = smov 0  }
  0x12 LB: > { %1569 = sst [smem:[#allocation11_spill]] %s1094_s23  ;;  %s681_s7 = sadd.s32 4294967295, %s1126_s6   ;;  %s1126_s6 = sphi %s1192_s6, %s24_s6   ;;  %s1122_s30 = sphi %s1190_s30, %s1621_s30   ;;  %s1118_s29 = sphi %s1188_s29, %s1620_s29   ;;  %s1114_s28 = sphi %s1186_s28, %s1619_s28   ;;  %s1110_s27 = sphi %s1184_s27, %s1618_s27   ;;  %s1106_s26 = sphi %s1182_s26, %s1606_s26   ;;  %s1102_s25 = sphi %s1180_s25, %s1617_s25   ;;  %s1098_s24 = sphi %s1178_s24, %s1616_s24   ;;  %s1094_s23 = sphi %s1176_s23, %s1615_s23   ;;  %s1090_s22 = sphi %s1174_s22, %s1614_s22   ;;  %s1086_s21 = sphi %s1172_s21, %s1613_s21   ;;  %s1082_s20 = sphi %s1170_s20, %s1612_s20   ;;  %s1078_s19 = sphi %s1168_s19, %s1611_s19   ;;  %s1074_s18 = sphi %s1166_s18, %s1610_s18  }
  0x13   : > { %1570 = sst [smem:[#allocation12_spill]] %s1106_s26  ;;  %s33_s8 = sadd.s32 1, %s1118_s29 }
  0x14   : > { %1571 = sst [smem:[#allocation13_spill]] %s1110_s27  ;;  %p1236_p0 = scmp.ge.s32.totalorder %s33_s8, 2 }
  0x15   : > { %s43_s10 = sadd.s32 1, %s1106_s26  ;;  %p50_p1 = scmp.ne.s32.totalorder %s1106_s26, %s1102_s25 }
  0x16   : > { %p51_p2 = scmp.eq.s32.totalorder %s1126_s6, 0  ;;  %s1623_s8 = smov (%p1236_p0, %s33_s8), 0 }
  0x17   : > { %1573 = sst [smem:[#allocation14_spill]] %s1623_s8  ;;  %p56_p4 = scmp.ne.s32.totalorder %s1102_s25, %s1098_s24 }
  0x18   : > { %p1250_p3 = por %p51_p2, %p50_p1  ;;  %s1257_s12 = ssub.s32 %s1118_s29, %s1623_s8 }
  0x19   : > { %p1259_p5 = scmp.eq.s32.totalorder %s681_s7, 0  ;;  %p41_p6 = scmp.eq.s32.totalorder %s1257_s12, 0 }
  0x1a   : > { %p1264_p7 = scmp.eq.s32.totalorder %s681_s7, 3  ;;  %p1557_p9 = scmp.lt.s32.totalorder %s1126_s6, 4 }
  0x1b   : > { %p1270_p8 = por %p1259_p5, %p56_p4  ;;  %s208_s17 = sand.u32 1, %s1106_s26  }
  0x1c   : > { %s1275_s16 = scalar_select %p41_p6, %s1106_s26, %s43_s10  }
  0x1d   : > { %s685_s24 = sshll.u32 %s208_s17, 5  ;;  %s686_s8 = sshll.u32 %s1118_s29, 3 }
  0x1e   : > { %1578 = sst [smem:[#allocation15_spill]] %s1275_s16  ;;  %s212_s3 = scalar_lea.vmem [#allocation2], %s685_s24 }
  0x1f   : > { %s1579_s0 = sld [smem:[#allocation19_spill]]  ;;  %s219_s27 = sshll.u32 %s212_s3, 4  ;;  %s220_s27 = int_to_ptr.vmem [resolvable:$true] %s219_s27 }
  0x20   : > { %p773_p10 = pnand %p1557_p9, %p1250_p3  ;;  %s209_s2 = scalar_lea.sflag [#allocation3], %s208_s17 }
  0x21   : > { %s1558_s5 = smov 256   ;;  %s1560_s10 = smov 8  }
  0x22   : > { %p691_p11 = scmp.ge.s32.totalorder %s1126_s6, 1  ;;  %p257_p12 = scmp.lt.s32.totalorder %s1126_s6, 5 }
  0x23   : > { %s682_s11 = sadd.s32 4294967294, %s1126_s6   ;;  %s36_s17 = sadd.s32 1, %s1122_s30 }
  0x24   : > { %p1292_p13 = pnand %p691_p11, %p257_p12  ;;  %s71_s24 = sadd.s32 1, %s1094_s23 }
  0x25   : > { %s216_s7 = scalar_lea.hbm %s1579_s0, %s686_s8  ;;  %s1559_s8 = smov 128  }
  0x26   : > { %s217_s4 = sshll.u32 %s216_s7, 4  ;;  %s1625_s17 = smov (!%p1236_p0, %s36_s17), %s1122_s30  ;;  %s218_s4 = int_to_ptr.hbm [resolvable:$true] %s217_s4 }
  0x27   : > { %775 = dma.hbm_to_vmem [thread:$0]  (!%p773_p10), %s218_s4, 512, %s220_s27, %s209_s2, %s1558_s5, %s1559_s8, %s1560_s10  }
  0x28   : > { %p78_p1 = scmp.ne.s32.totalorder %s1094_s23, %s1090_s22  ;;  %p84_p3 = scmp.ne.s32.totalorder %s1090_s22, %s1086_s21 }
  0x29   : > { %p38_p4 = scmp.ge.s32.totalorder %s1625_s17, 2  ;;  %s165_s4 = sadd.s32 1, %s1082_s20 }
  0x2a   : > { %p1309_p6 = por %p78_p1, %p51_p2  ;;  %p1315_p10 = por %p84_p3, %p1259_p5 }
  0x2b   : > { %s1627_s17 = smov (%p38_p4, %s1625_s17), 0  ;;  %p175_p0 = scmp.ne.s32.totalorder %s1082_s20, %s1078_s19 }
  0x2c   : > { %1583 = sst [smem:[#allocation16_spill]] %s1627_s17  ;;  %p181_p11 = scmp.ne.s32.totalorder %s1078_s19, %s1074_s18 }
  0x2d   : > { %s67_s21 = ssub.s32 %s1122_s30, %s1627_s17  ;;  %p182_p12 = scmp.eq.s32.totalorder %s682_s11, 3 }
  0x2e   : > { %s68_s9 = sor.u32 %s67_s21, %s1257_s12  ;;  %p163_p2 = scmp.eq.s32.totalorder %s67_s21, 0 }
  0x2f   : > { %p69_p1 = scmp.eq.s32.totalorder %s68_s9, 0  ;;  %p1330_p9 = por %p1264_p7, %p175_p0 }
  0x30   : > { %s1335_s2 = scalar_select %p163_p2, %s1082_s20, %s165_s4  }
  0x31   : > { %s1338_s5 = scalar_select %p69_p1, %s1094_s23, %s71_s24  }
  0x32   : > { %1585 = sst [smem:[#allocation17_spill]] %s1335_s2  ;;  %p1340_p5 = por %p182_p12, %p181_p11 }
  0x33   : > { %1586 = sst [smem:[#allocation18_spill]] %s1338_s5  ;;  %s229_s10 = sand.u32 1, %s1094_s23  }
  0x34   : > { %s687_s11 = sshll.u32 %s229_s10, 7  ;;  %s705_s12 = sshll.u32 %s1118_s29, 5 }
  0x35   : > { %s238_s0 = sadd.s32 %s1122_s30, %s705_s12  ;;  %s233_s17 = scalar_lea.vmem [#allocation5], %s687_s11 }
  0x36   : > { %s243_s21 = sshll.u32 %s233_s17, 4  ;;  %s690_s9 = sshll.u32 %s238_s0, 3  ;;  %s244_s21 = int_to_ptr.vmem [resolvable:$true] %s243_s21 }
  0x37   : > { %s240_s26 = scalar_lea.hbm %s1548_s1, %s690_s9  ;;  %p1588_p7 = scmp.lt.s32.totalorder %s1126_s6, 4 }
  0x38   : > { %s241_s24 = sshll.u32 %s240_s26, 4  ;;  %s230_s4 = scalar_lea.sflag [#allocation6], %s229_s10  ;;  %s242_s24 = int_to_ptr.hbm [resolvable:$true] %s241_s24 }
  0x39   : > { %p776_p3 = pnand %p1588_p7, %p1309_p6  ;;  %s1589_s5 = smov 8  }
  0x3a   : > { %s1590_s2 = smov 128   ;;  %s1591_s23 = smov 256  }
  0x3b   : > { %778 = dma.hbm_to_vmem [thread:$0]  (!%p776_p3), %s242_s24, 2048, %s244_s21, %s230_s4, %s1591_s23, %s1590_s2, %s1589_s5  }
  0x3c   : > { %261 = sbr.rel (%p1292_p13) target bundleno = 570 (0x23a), region = 40  ;;  %s263_s0 = sand.u32 (!%p1292_p13), 1, %s1102_s25  }
  0x3d   : > { %s692_s17 = sshll.u32 (!%p1292_p13), %s263_s0, 5  ;;  %s264_s11 = scalar_lea.sflag (!%p1292_p13), [#allocation3], %s263_s0 }
  0x3e   : > { %s1360_s16 = scalar_lea.vmem (!%p1292_p13), [#allocation2], %s692_s17 }
  0x41   : > { %1061 = dma.done.wait (%p1270_p8), %s264_s11, 512  }
  0x42   : > { %1063 = vsyncadd (%p1270_p8), %s264_s11, 4294966784  ;;  %s273_s26 = sand.u32 1, %s1090_s22  }
  0x43   : > { %s693_s10 = sshll.u32 %s273_s26, 7  ;;  %s274_s23 = scalar_lea.sflag [#allocation6], %s273_s26 }
  0x44   : > { %s1367_s5 = scalar_lea.vmem [#allocation5], %s693_s10 }
  0x45   : > { %1065 = dma.done.wait (%p1315_p10), %s274_s23, 2048  }
  0x46   : > { %1067 = vsyncadd (%p1315_p10), %s274_s23, 4294965248  ;;  %s310_s3 = sand.u32 1, %s1078_s19   ;;  %p314_p13 = scmp.lt.s32.totalorder %s1114_s28, 1 }
  0x47   : > { %s694_s15 = sshll.u32 %s310_s3, 5  ;;  %s1592_s21 = sld [smem:[#allocation22_spill]] }
  0x48   : > { %s1378_s27 = scalar_select %p314_p13, %s1114_s28, 1 }
  0x49   : > { %s1384_s14 = scalar_lea.vmem [#allocation7], %s694_s15  ;;  %s1593_s24 = sld [smem:[#allocation13_spill]] }
  0x4d   : > { %s316_s9 = scalar_lea.vmem %s1592_s21, %s1378_s27 }
  0x4f   : > { %p695_p8 = scmp.ne.s32.totalorder %s1593_s24, 0 }
  0x51   : > { %320 = sbr.rel (%p695_p8) target bundleno = 91 (0x5b), region = 52 }
  0x56   : > { %v1131_v0 = vmov 0.0  }
  0x57   : > { %321 = vst [vmem:[%s1384_s14] sm:$0xff] %v1131_v0 }
  0x58   : > { %322 = vst [vmem:[%s1384_s14 + $0x8] sm:$0xff] %v1131_v0 }
  0x59   : > { %323 = vst [vmem:[%s1384_s14 + $0x10] sm:$0xff] %v1131_v0 }
  0x5a   : > { %324 = vst [vmem:[%s1384_s14 + $0x18] sm:$0xff] %v1131_v0 }
  0x5b PF: > { %v348_v1 = vld [vmem:[%s1367_s5 + $0x78] sm:$0xff]  ;;  %v347_v2 = vld [vmem:[%s1367_s5 + $0x70] sm:$0xff]  ;;  %v346_v3 = vld [vmem:[%s1367_s5 + $0x68] sm:$0xff]  ;;  %s1594_s7 = sld [smem:[#allocation13_spill]] }
  0x5c   : > { %707 = vmatpush.msra.mxu2 %v348_v1  ;;  %708 = vmatpush.msra.mxu3 %v348_v1  ;;  %v345_v4 = vld [vmem:[%s1367_s5 + $0x60] sm:$0xff]  ;;  %v344_v5 = vld [vmem:[%s1367_s5 + $0x58] sm:$0xff]  ;;  %v343_v6 = vld [vmem:[%s1367_s5 + $0x50] sm:$0xff] }
  0x5d   : > { %349 = vmatpush.msra.mxu0 %v348_v1  ;;  %706 = vmatpush.msra.mxu1 %v348_v1  ;;  %v342_v7 = vld [vmem:[%s1367_s5 + $0x48] sm:$0xff]  ;;  %v341_v8 = vld [vmem:[%s1367_s5 + $0x40] sm:$0xff]  ;;  %v340_v9 = vld [vmem:[%s1367_s5 + $0x38] sm:$0xff] }
  0x5e   : > { %710 = vmatpush.msra.mxu2 %v347_v2  ;;  %711 = vmatpush.msra.mxu3 %v347_v2  ;;  %v339_v10 = vld [vmem:[%s1367_s5 + $0x30] sm:$0xff]  ;;  %v338_v11 = vld [vmem:[%s1367_s5 + $0x28] sm:$0xff]  ;;  %v337_v12 = vld [vmem:[%s1367_s5 + $0x20] sm:$0xff] }
  0x5f   : > { %350 = vmatpush.msra.mxu0 %v347_v2  ;;  %709 = vmatpush.msra.mxu1 %v347_v2  ;;  %v336_v13 = vld [vmem:[%s1367_s5 + $0x18] sm:$0xff]  ;;  %v335_v14 = vld [vmem:[%s1367_s5 + $0x10] sm:$0xff]  ;;  %v334_v15 = vld [vmem:[%s1367_s5 + $0x8] sm:$0xff] }
  0x60   : > { %713 = vmatpush.msra.mxu2 %v346_v3  ;;  %714 = vmatpush.msra.mxu3 %v346_v3  ;;  %v333_v16 = vld [vmem:[%s1367_s5] sm:$0xff]  ;;  %v331_v17 = vld [vmem:[%s1360_s16 + $0x10] sm:$0xff]  ;;  %v332_v18 = vld [vmem:[%s1360_s16 + $0x18] sm:$0xff] }
  0x61   : > { %351 = vmatpush.msra.mxu0 %v346_v3  ;;  %712 = vmatpush.msra.mxu1 %v346_v3  ;;  %v329_v19 = vld [vmem:[%s1360_s16] sm:$0xff]  ;;  %v330_v20 = vld [vmem:[%s1360_s16 + $0x8] sm:$0xff]  ;;  %v327_v27 = vld [vmem:[%s1384_s14 + $0x10] sm:$0xff]  ;;  %p696_p4 = scmp.ne.s32.totalorder %s1594_s7, 1 }
  0x62   : > { %716 = vmatpush.msra.mxu2 %v345_v4  ;;  %717 = vmatpush.msra.mxu3 %v345_v4  ;;  %v325_v21 = vld [vmem:[%s1384_s14] sm:$0xff]  ;;  %v326_v22 = vld [vmem:[%s1384_s14 + $0x8] sm:$0xff]  ;;  %v328_v28 = vld [vmem:[%s1384_s14 + $0x18] sm:$0xff]  ;;  %s1595_s17 = sld [smem:[#allocation21_spill]] (!%p696_p4) }
  0x63   : > { %352 = vmatpush.msra.mxu0 %v345_v4  ;;  %715 = vmatpush.msra.mxu1 %v345_v4 }
  0x64   : > { %719 = vmatpush.msra.mxu2 %v344_v5  ;;  %720 = vmatpush.msra.mxu3 %v344_v5 }
  0x65   : > { %353 = vmatpush.msra.mxu0 %v344_v5  ;;  %718 = vmatpush.msra.mxu1 %v344_v5 }
  0x66   : > { %722 = vmatpush.msra.mxu2 %v343_v6  ;;  %723 = vmatpush.msra.mxu3 %v343_v6 }
  0x67   : > { %354 = vmatpush.msra.mxu0 %v343_v6  ;;  %721 = vmatpush.msra.mxu1 %v343_v6 }
  0x68   : > { %725 = vmatpush.msra.mxu2 %v342_v7  ;;  %726 = vmatpush.msra.mxu3 %v342_v7 }
  0x69   : > { %355 = vmatpush.msra.mxu0 %v342_v7  ;;  %724 = vmatpush.msra.mxu1 %v342_v7 }
  0x6a   : > { %728 = vmatpush.msra.mxu2 %v341_v8  ;;  %729 = vmatpush.msra.mxu3 %v341_v8 }
  0x6b   : > { %356 = vmatpush.msra.mxu0 %v341_v8  ;;  %727 = vmatpush.msra.mxu1 %v341_v8 }
  0x6c   : > { %731 = vmatpush.msra.mxu2 %v340_v9  ;;  %732 = vmatpush.msra.mxu3 %v340_v9 }
  0x6d   : > { %357 = vmatpush.msra.mxu0 %v340_v9  ;;  %730 = vmatpush.msra.mxu1 %v340_v9 }
  0x6e   : > { %734 = vmatpush.msra.mxu2 %v339_v10  ;;  %735 = vmatpush.msra.mxu3 %v339_v10 }
  0x6f   : > { %358 = vmatpush.msra.mxu0 %v339_v10  ;;  %733 = vmatpush.msra.mxu1 %v339_v10 }
  0x70   : > { %737 = vmatpush.msra.mxu2 %v338_v11  ;;  %738 = vmatpush.msra.mxu3 %v338_v11 }
  0x71   : > { %359 = vmatpush.msra.mxu0 %v338_v11  ;;  %736 = vmatpush.msra.mxu1 %v338_v11 }
  0x72   : > { %740 = vmatpush.msra.mxu2 %v337_v12  ;;  %741 = vmatpush.msra.mxu3 %v337_v12 }
  0x73   : > { %360 = vmatpush.msra.mxu0 %v337_v12  ;;  %739 = vmatpush.msra.mxu1 %v337_v12 }
  0x74   : > { %743 = vmatpush.msra.mxu2 %v336_v13  ;;  %744 = vmatpush.msra.mxu3 %v336_v13 }
  0x75   : > { %361 = vmatpush.msra.mxu0 %v336_v13  ;;  %742 = vmatpush.msra.mxu1 %v336_v13 }
  0x76   : > { %746 = vmatpush.msra.mxu2 %v335_v14  ;;  %747 = vmatpush.msra.mxu3 %v335_v14 }
  0x77   : > { %362 = vmatpush.msra.mxu0 %v335_v14  ;;  %745 = vmatpush.msra.mxu1 %v335_v14 }
  0x78   : > { %749 = vmatpush.msra.mxu2 %v334_v15  ;;  %750 = vmatpush.msra.mxu3 %v334_v15 }
  0x79   : > { %363 = vmatpush.msra.mxu0 %v334_v15  ;;  %748 = vmatpush.msra.mxu1 %v334_v15 }
  0x7a   : > { %752 = vmatpush.msra.mxu2 %v333_v16  ;;  %753 = vmatpush.msra.mxu3 %v333_v16 }
  0x7b   : > { %371 = vmatmul.f32.vlgmr.msra.gmra.mxu2 %v331_v17  ;;  %374 = vmatmul.f32.vlgmr.msra.gmra.mxu3 %v332_v18 }
  0x7c   : > { %364 = vmatpush.msra.mxu0 %v333_v16  ;;  %751 = vmatpush.msra.mxu1 %v333_v16 }
  0x7d   : > { %365 = vmatmul.f32.vlgmr.msra.gmra.mxu0 %v329_v19  ;;  %368 = vmatmul.f32.vlgmr.msra.gmra.mxu1 %v330_v20 }
  0xfa   : > { %v366_v23 = vpop.f32.mrf.mxu0  ;;  %v369_v24 = vpop.f32.mrf.mxu1 }
  0xfb   : > { %v378_v25 = vadd.f32 %v366_v23, %v325_v21  ;;  %v379_v26 = vadd.f32 %v369_v24, %v326_v22 }
  0xfd   : > { %382 = vst [vmem:[%s1384_s14] sm:$0xff] %v378_v25 }
  0xfe   : > { %383 = vst [vmem:[%s1384_s14 + $0x8] sm:$0xff] %v379_v26  ;;  %v372_v29 = vpop.f32.mrf.mxu2  ;;  %v375_v30 = vpop.f32.mrf.mxu3  ;;  %389 = sbr.rel (%p696_p4) target bundleno = 548 (0x224), region = 56 }
  0xff   : > { %v380_v31 = vadd.f32 %v372_v29, %v327_v27  ;;  %v381_v32 = vadd.f32 %v375_v30, %v328_v28 }
 0x101   : > { %384 = vst [vmem:[%s1384_s14 + $0x10] sm:$0xff] %v380_v31 }
 0x102   : > { %385 = vst [vmem:[%s1384_s14 + $0x18] sm:$0xff] %v381_v32 }
 0x103   : > { %v393_v33 = vld [vmem:[%s1595_s17 + $0x18] sm:$0xff]  ;;  %v391_v34 = vld [vmem:[%s1595_s17 + $0x8] sm:$0xff]  ;;  %v1132_v35 = vmov 0   ;;  %v392_v38 = vld [vmem:[%s1595_s17 + $0x10] sm:$0xff] }
 0x104   : > { %906 = vset.pattern.permute.xlu1 %v1132_v35  ;;  %905 = vset.pattern.permute.xlu0 %v1132_v35  ;;  %v397_v36 = vmul.f32 0.8, %v393_v33  ;;  %v395_v37 = vmul.f32 0.8, %v391_v34  ;;  %v390_v39 = vld [vmem:[%s1595_s17] sm:$0xff] }
 0x105   : > { %v396_v40 = vmul.f32 0.8, %v392_v38  ;;  %v394_v41 = vmul.f32 0.8, %v390_v39  ;;  %v907_v42 = vld [vmem:[%s316_s9] ss:$0 sm:$0xff] }
 0x106   : > { %416 = vperm.xlu0 %905, %v397_v36   ;;  %406 = vperm.xlu1 %906, %v395_v37   ;;  %v495_v32 = vld [vmem:[%s1384_s14 + $0x8] sm:$0xff]  ;;  %v494_v37 = vld [vmem:[%s1384_s14] sm:$0xff]  ;;  %s1599_s9 = sld [smem:[#allocation20_spill]] }
 0x108   : > { %v496_v26 = vld [vmem:[%s1384_s14 + $0x10] sm:$0xff] }
 0x109   : > { %v497_v4 = vld [vmem:[%s1384_s14 + $0x18] sm:$0xff] }
 0x10e   : > { %411 = vperm.xlu0 %905, %v396_v40   ;;  %401 = vperm.xlu1 %906, %v394_v41   ;;  %v492_v40 = vld [vmem:[%s1599_s9 + $0x10] sm:$0xff]  ;;  %v493_v41 = vld [vmem:[%s1599_s9 + $0x18] sm:$0xff] }
 0x178   : > { %v417_v43 = vpop.permute.xlu0 %416  ;;  %v407_v44 = vpop.permute.xlu1 %406 }
 0x179   : > { %v425_v45 = vmul.f32 %v907_v42, %v417_v43  ;;  %v423_v46 = vmul.f32 %v907_v42, %v407_v44  ;;  %v491_v43 = vld [vmem:[%s1599_s9 + $0x8] sm:$0xff] }
 0x17b   : > { %v429_v47 = vsub.f32 1.0, %v425_v45  ;;  %v1437_v48 = vsub.f32 1.0, %v423_v46 }
 0x17d   : > { %908 = vrcp.f32 %v429_v47  ;;  %v486_v61 = vand.u32 2147483648, %v429_v47  ;;  %v484_v63 = vand.u32 2147483647, %v429_v47  ;;  %vm480_vm1 = vweird.f32 %v429_v47 }
 0x17e   : > { %910 = vrcp.f32 %v1437_v48  ;;  %vm450_vm5 = vweird.f32 %v1437_v48  ;;  %v456_v15 = vand.u32 2147483648, %v1437_v48  ;;  %v454_v18 = vand.u32 2147483647, %v1437_v48 }
 0x17f   : > { %v487_v3 = vor.u32 1.1754944e-38, %v486_v61  ;;  %vm485_vm3 = vcmp.eq.f32.partialorder %v484_v63, 8.507059e+37 }
 0x180   : > { %v412_v49 = vpop.permute.xlu0 %411  ;;  %v402_v50 = vpop.permute.xlu1 %401  ;;  %v457_v27 = vor.u32 1.1754944e-38, %v456_v15  ;;  %vm455_vm13 = vcmp.eq.f32.partialorder %v454_v18, 8.507059e+37 }
 0x181   : > { %v424_v51 = vmul.f32 %v907_v42, %v412_v49  ;;  %v422_v52 = vmul.f32 %v907_v42, %v402_v50  ;;  %v490_v42 = vld [vmem:[%s1599_s9] sm:$0xff] }
 0x183   : > { %v909_v53 = vpop.eup %908  ;;  %v428_v54 = vsub.f32 1.0, %v424_v51  ;;  %v1440_v55 = vsub.f32 1.0, %v422_v52 }
 0x184   : > { %v911_v56 = vpop.eup %910  ;;  %v476_v57 = vmul.f32 %v909_v53, %v429_v47  ;;  %vm481_vm0 = vweird.f32 %v909_v53 }
 0x185   : > { %v446_v58 = vmul.f32 %v911_v56, %v1437_v48  ;;  %912 = vrcp.f32 %v428_v54  ;;  %vm482_vm2 = vmor %vm480_vm1, %vm481_vm0  ;;  %vm451_vm4 = vweird.f32 %v911_v56  ;;  %v471_v14 = vand.u32 2147483648, %v428_v54 }
 0x186   : > { %v477_v59 = vsub.f32 1.0, %v476_v57  ;;  %914 = vrcp.f32 %v1440_v55  ;;  %v469_v17 = vand.u32 2147483647, %v428_v54  ;;  %vm1449_vm7 = vmor %vm450_vm5, %vm451_vm4  ;;  %v441_v21 = vand.u32 2147483648, %v1440_v55 }
 0x187   : > { %v447_v60 = vsub.f32 1.0, %v446_v58  ;;  %vm465_vm9 = vweird.f32 %v428_v54  ;;  %v439_v24 = vand.u32 2147483647, %v1440_v55  ;;  %vm435_vm10 = vweird.f32 %v1440_v55 }
 0x188   : > { %v478_v62 = vmul.f32 %v909_v53, %v477_v59  ;;  %v472_v25 = vor.u32 1.1754944e-38, %v471_v14  ;;  %vm470_vm12 = vcmp.eq.f32.partialorder %v469_v17, 8.507059e+37  ;;  %v442_v34 = vor.u32 1.1754944e-38, %v441_v21 }
 0x189   : > { %v448_v0 = vmul.f32 %v911_v56, %v447_v60  ;;  %vm440_vm15 = vcmp.eq.f32.partialorder %v439_v24, 8.507059e+37  ;;  %vm502_vm0 = vcmask 261120  }
 0x18a   : > { %v479_v1 = vadd.f32 %v909_v53, %v478_v62 }
 0x18b   : > { %v913_v2 = vpop.eup %912  ;;  %v449_v12 = vadd.f32 %v911_v56, %v448_v0 }
 0x18c   : > { %v915_v5 = vpop.eup %914  ;;  %v461_v6 = vmul.f32 %v913_v2, %v428_v54  ;;  %v483_v7 = vsel %vm482_vm2, %v909_v53, %v479_v1  ;;  %vm466_vm6 = vweird.f32 %v913_v2 }
 0x18d   : > { %v431_v8 = vmul.f32 %v915_v5, %v1440_v55  ;;  %v488_v9 = vsel %vm485_vm3, %v487_v3, %v483_v7  ;;  %vm436_vm8 = vweird.f32 %v915_v5  ;;  %v453_v23 = vsel %vm1449_vm7, %v911_v56, %v449_v12  ;;  %vm467_vm11 = vmor %vm465_vm9, %vm466_vm6 }
 0x18e   : > { %v462_v10 = vsub.f32 1.0, %v461_v6  ;;  %v501_v11 = vmul.f32 %v497_v4, %v488_v9  ;;  %vm437_vm14 = vmor %vm435_vm10, %vm436_vm8  ;;  %v458_v31 = vsel %vm455_vm13, %v457_v27, %v453_v23 }
 0x18f   : > { %v432_v13 = vsub.f32 1.0, %v431_v8  ;;  %v499_v38 = vmul.f32 %v495_v32, %v458_v31 }
 0x190   : > { %v463_v16 = vmul.f32 %v913_v2, %v462_v10  ;;  %527 = vmatpush.msra.mxu0 %v501_v11  ;;  %754 = vmatpush.msra.mxu1 %v501_v11 }
 0x191   : > { %v433_v19 = vmul.f32 %v915_v5, %v432_v13  ;;  %755 = vmatpush.msra.mxu2 %v501_v11  ;;  %756 = vmatpush.msra.mxu3 %v501_v11 }
 0x192   : > { %v464_v22 = vadd.f32 %v913_v2, %v463_v16 }
 0x193   : > { %v434_v28 = vadd.f32 %v915_v5, %v433_v19 }
 0x194   : > { %v468_v29 = vsel %vm467_vm11, %v913_v2, %v464_v22 }
 0x195   : > { %v473_v30 = vsel %vm470_vm12, %v472_v25, %v468_v29  ;;  %v438_v33 = vsel %vm437_vm14, %v915_v5, %v434_v28 }
 0x196   : > { %v500_v35 = vmul.f32 %v496_v26, %v473_v30  ;;  %v443_v36 = vsel %vm440_vm15, %v442_v34, %v438_v33 }
 0x197   : > { %v498_v39 = vmul.f32 %v494_v37, %v443_v36 }
 0x198   : > { %528 = vmatpush.msra.mxu0 %v500_v35  ;;  %757 = vmatpush.msra.mxu1 %v500_v35 }
 0x199   : > { %758 = vmatpush.msra.mxu2 %v500_v35  ;;  %759 = vmatpush.msra.mxu3 %v500_v35 }
 0x19a   : > { %529 = vmatpush.msra.mxu0 %v499_v38  ;;  %760 = vmatpush.msra.mxu1 %v499_v38 }
 0x19b   : > { %761 = vmatpush.msra.mxu2 %v499_v38  ;;  %762 = vmatpush.msra.mxu3 %v499_v38 }
 0x19c   : > { %530 = vmatpush.msra.mxu0 %v498_v39  ;;  %763 = vmatpush.msra.mxu1 %v498_v39 }
 0x19d   : > { %764 = vmatpush.msra.mxu2 %v498_v39  ;;  %765 = vmatpush.msra.mxu3 %v498_v39 }
 0x19e   : > { %699 = vmatmul.msk.f32.vlgmr.msra.gmra.mxu2 %vm502_vm0, %v492_v40  ;;  %700 = vmatmul.msk.f32.vlgmr.msra.gmra.mxu3 %vm502_vm0, %v493_v41 }
 0x19f   : > { %697 = vmatmul.msk.f32.vlgmr.msra.gmra.mxu0 %vm502_vm0, %v490_v42  ;;  %698 = vmatmul.msk.f32.vlgmr.msra.gmra.mxu1 %vm502_vm0, %v491_v43 }
 0x21c   : > { %v532_v44 = vpop.f32.mrf.mxu0  ;;  %v535_v45 = vpop.f32.mrf.mxu1 }
 0x21d   : > { %544 = vst [vmem:[%s1384_s14] sm:$0xff] %v532_v44 }
 0x21e   : > { %545 = vst [vmem:[%s1384_s14 + $0x8] sm:$0xff] %v535_v45 }
 0x221   : > { %v538_v46 = vpop.f32.mrf.mxu2  ;;  %v541_v47 = vpop.f32.mrf.mxu3 }
 0x222   : > { %546 = vst [vmem:[%s1384_s14 + $0x10] sm:$0xff] %v538_v46 }
 0x223   : > { %547 = vst [vmem:[%s1384_s14 + $0x18] sm:$0xff] %v541_v47 }
 0x224 PF: > { %s702_s26 = sshll.u32 %s1114_s28, 3  ;;  %s1600_s5 = sld [smem:[#allocation23_spill]] }
 0x225   : > { %s560_s2 = sshll.u32 %s1384_s14, 4  ;;  %s549_s27 = scalar_lea.sflag [#allocation4], %s310_s3  ;;  %s561_s2 = int_to_ptr.vmem [resolvable:$true] %s560_s2 }
 0x22a   : > { %s559_s15 = scalar_lea.hbm %s1600_s5, %s702_s26  ;;  %s996_s28 = scalar_lea.hbm %s1600_s5, 64 }
 0x22b   : > { %s562_s12 = sshll.u32 %s559_s15, 4  ;;  %s563_s12 = int_to_ptr.hbm [resolvable:$true] %s562_s12 }
 0x22c   : > { %s990_s21 = sshra.s32 %s563_s12, 4  ;;  %s991_s21 = int_to_ptr.hbm [resolvable:$true] %s990_s21 }
 0x22d   : > { %s992_s24 = scalar_lea.hbm %s991_s21, 32  ;;  %p997_p11 = scmp.lt.s32.totalorder %s991_s21, %s1600_s5 }
 0x22e   : > { %p993_p6 = scmp.ne.s32.totalorder %s991_s21, %s992_s24  ;;  %p998_p12 = scmp.lt.s32.totalorder %s996_s28, %s992_s24 }
 0x230   : > { %p994_p10 = pnand %p993_p6, %p1330_p9  ;;  %p999_p2 = por %p998_p12, %p997_p11 }
 0x232   : > { %p995_p0 = pneg %p994_p10 }
 0x234   : > { %p1000_p1 = pnand %p999_p2, %p995_p0 }
 0x236   : > { %1003 = shalt.err (!%p1000_p1)
}
 0x237   : > { %s1133_s3 = smov 128   ;;  %s1134_s14 = smov 256  }
 0x238   : > { %s1135_s16 = smov 8  }
 0x239   : > { %770 = dma.vmem_to_hbm [thread:$0]  (%p1330_p9), %s561_s2, 512, %s563_s12, %s549_s27, %s1133_s3, %s1134_s14, %s1135_s16  }
 0x23a PF: > { %p784_p7 = scmp.ge.s32.totalorder %s1126_s6, 2  ;;  %s577_s26 = sand.u32 1, %s1074_s18  }
 0x23b   : > { %s578_s10 = scalar_lea.sflag [#allocation4], %s577_s26 }
 0x23c   : > { %p780_p3 = pnand %p784_p7, %p1340_p5 }
 0x23e   : > { %p781_p13 = pneg %p780_p3 }
 0x240   : > { %1069 = dma.done.wait (%p781_p13), %s578_s10, 512  }
 0x241   : > { %1071 = vsyncadd (%p781_p13), %s578_s10, 4294966784  ;;  %s24_s6 = sadd.s32 1, %s1126_s6   ;;  %s1602_s13 = sld [smem:[#allocation17_spill]] }
 0x242   : > { %p1500_p8 = scmp.ge.s32.totalorder %s24_s6, 6   ;;  %s1603_s15 = sld [smem:[#allocation11_spill]] }
 0x243   : > { %s1604_s2 = sld [smem:[#allocation18_spill]]  ;;  %s1610_s18 = smov %s1078_s19 }
 0x244   : > { %s1605_s12 = sld [smem:[#allocation12_spill]]  ;;  %s1611_s19 = smov %s1082_s20 }
 0x245   : > { %s1606_s26 = sld [smem:[#allocation15_spill]]  ;;  %s1613_s21 = smov %s1090_s22 }
 0x246   : > { %s1607_s8 = sld [smem:[#allocation14_spill]]  ;;  %s1616_s24 = smov %s1102_s25 }
 0x247   : > { %s1608_s7 = sld [smem:[#allocation16_spill]]  ;;  %s1612_s20 = smov %s1602_s13 }
 0x248   : > { %s1614_s22 = smov %s1603_s15  ;;  %s1618_s27 = smov %s1118_s29 }
 0x249   : > { %s1615_s23 = smov %s1604_s2  ;;  %s1619_s28 = smov %s1122_s30 }
 0x24a   : > { %s1617_s25 = smov %s1605_s12  ;;  %23 = sbr.rel (!%p1500_p8) target bundleno = 18 (0x12), region = 109 }
 0x24c   : > { %s1620_s29 = smov %s1607_s8 }
 0x24d   : > { %s1621_s30 = smov %s1608_s7 }
 0x24f   :  { %584 = vsyncpa [#allocation3], 1 }
 0x250   :  { %586 = vsyncpa [#allocation3 + $0x1], 1 }
 0x251   :  { %587 = vsyncpa [#allocation6], 1 }
 0x252   :  { %589 = vsyncpa [#allocation6 + $0x1], 1 }
 0x253   :  { %590 = vsyncpa [#allocation4], 1 }
 0x254   :  { %592 = vsyncpa [#allocation4 + $0x1], 1 }

</bundles_post_ra>
